<compile_context>
chip_gen: v7x
topology: tpu7x:2x2x1
jax: 0.10.0
libtpu: 0.0.40
codegen_flags: <defaults>
</compile_context>

<pallas_src>
import math
import functools

import jax
import jax.numpy as jnp
from jax import lax
from jax.experimental import pallas as pl
from jax.experimental.pallas import tpu as pltpu


# --------------------------------------------------------------------------------------
# Kernel
# --------------------------------------------------------------------------------------
def _flash_attn_kernel(q_ref, k_ref, v_ref, o_ref,
                       qs_ref, m_ref, l_ref, acc_ref, *,
                       scale2, s_valid, tk, mask_last):
    """One (head-block, q-tile, k-tile) step of channels-first flash attention.

    q_ref:   (BT, C, tq) in-dtype      o_ref:   (BT, C, tq) in-dtype
    k_ref:   (BT, C, tk) in-dtype      qs_ref:  (BT, C, tq) in-dtype, q*scale^2 (resident)
    v_ref:   (BT, C, tk) in-dtype      m_ref:   (BT, 1, tq) f32 running max
                                       l_ref:   (BT, 1, tq) f32 running sum
                                       acc_ref: (BT, C, tq) f32 un-normalized output
    """
    si = pl.program_id(2)
    n_s = pl.num_programs(2)

    @pl.when(si == 0)
    def _():
        # q block is resident across the S axis (index_map ignores s): fold the softmax
        # scale (scale^2 == 1/sqrt(ch)) into it exactly once per (head-block, q-tile).
        qs_ref[...] = q_ref[...] * scale2
        m_ref[...] = jnp.full_like(m_ref, -jnp.inf)
        l_ref[...] = jnp.zeros_like(l_ref)
        acc_ref[...] = jnp.zeros_like(acc_ref)

    # logits[b, s, t] = sum_c k[b, c, s] * q[b, c, t]   (== einsum 'bcs,bct->bst')
    # Contract on dim 1 of both operands: the MXU streams the transposed LHS directly,
    # no swapaxes/XLU copy per step.  Operands stay in input dtype; accumulate f32.
    w = lax.dot_general(
        k_ref[...], qs_ref[...],
        dimension_numbers=(((1,), (1,)), ((0,), (0,))),
        preferred_element_type=jnp.float32)           # (BT, tk, tq) f32

    if mask_last:
        # Only the (statically known) ragged last S tile contains out-of-range keys, so
        # the iota/compare/select only runs there.  Finite mask value avoids NaNs from
        # exp(-inf - -inf) even in degenerate cases.
        def _mask(wv):
            s_ids = lax.broadcasted_iota(jnp.int32, wv.shape, 1) + si * tk
            return jnp.where(s_ids < s_valid, wv, -1e30)

        w = lax.cond(si == n_s - 1, _mask, lambda wv: wv, w)

    m_prev = m_ref[...]                                               # (BT, 1, tq)
    m_new = jnp.maximum(m_prev, jnp.max(w, axis=1, keepdims=True))    # (BT, 1, tq)
    alpha = jnp.exp(m_prev - m_new)
    p = jnp.exp(w - m_new)                                            # (BT, tk, tq) f32

    l_ref[...] = alpha * l_ref[...] + jnp.sum(p, axis=1, keepdims=True)

    # pv[b, c, t] = sum_s v[b, c, s] * p[b, s, t]   (== einsum 'bcs,bst->bct')
    pv = lax.dot_general(
        v_ref[...], p.astype(v_ref.dtype),
        dimension_numbers=(((2,), (1,)), ((0,), (0,))),
        preferred_element_type=jnp.float32)           # (BT, C, tq) f32

    acc_ref[...] = alpha * acc_ref[...] + pv
    m_ref[...] = m_new

    @pl.when(si == n_s - 1)
    def _():
        inv_l = pl.reciprocal(l_ref[...], approx=False)   # exact: keeps 1e-5 tolerance
        o_ref[...] = (acc_ref[...] * inv_l).astype(o_ref.dtype)


# --------------------------------------------------------------------------------------
# Tiling / VMEM heuristics (generation-aware)
# --------------------------------------------------------------------------------------
def _vmem_capacity_bytes():
    try:
        info = pltpu.get_tpu_info()
        for attr in ("vmem_capacity_bytes", "vmem_bytes", "vmem_size_bytes"):
            v = getattr(info, attr, None)
            if v:
                return int(v)
    except Exception:
        pass
    return 64 << 20  # conservative default (v7x per-TensorCore VMEM)


def _kernel_vmem_bytes(bt, C, tq, tk, itemsize):
    dbl_in = 2 * bt * C * (tq + 2 * tk) * itemsize                # q/k/v double-buffered
    dbl_out = 2 * bt * C * tq * itemsize                          # output double-buffered
    scratch = bt * (2 * tq * 4 + C * tq * 4 + C * tq * itemsize)  # m, l, acc, q_scaled
    temps = bt * tk * tq * (4 + 4 + itemsize) + bt * C * tq * 4   # w, p, p-cast, pv
    return dbl_in + dbl_out + scratch + temps


def _pick_tile(dim):
    """Full extent for small dims (no padding/ragged work), else the lane-aligned tile
    from {512, 384, 256, 128} that minimizes ragged waste (tie-break: bigger tile)."""
    if dim <= 512:
        return dim
    return min((512, 384, 256, 128), key=lambda t: (pl.cdiv(dim, t) * t - dim, -t))


def _shrink_tile(t):
    for c in (384, 256, 128):
        if c < t:
            return c
    return t


def _choose_tiles(BH, T, S, C, itemsize, budget):
    tq = _pick_tile(T)
    tk = _pick_tile(S)

    # Shrink tiles (lane-aligned) if even a single head exceeds the budget.
    while _kernel_vmem_bytes(1, C, tq, tk, itemsize) > budget:
        if tk >= tq and tk > 128:
            nk = _shrink_tile(tk)
            if nk == tk:
                break
            tk = nk
        elif tq > 128:
            nq = _shrink_tile(tq)
            if nq == tq:
                break
            tq = nq
        else:
            break

    per_head = _kernel_vmem_bytes(1, C, tq, tk, itemsize)
    cap = max(1, min(BH, budget // max(per_head, 1)))

    # Prefer an exact divisor of BH (no ragged head block); accept a ragged last head
    # block (Pallas masks the writeback) only when divisors waste more than half the cap.
    bt = max(d for d in range(1, cap + 1) if BH % d == 0)
    if bt * 2 < cap:
        bt = cap

    # Megacore (v7x has 2 TensorCores): keep >=2 steps on the parallel grid axes.
    if pl.cdiv(BH, bt) * pl.cdiv(T, tq) < 2 and BH >= 2:
        bt = pl.cdiv(BH, 2)
    return tq, tk, bt


# --------------------------------------------------------------------------------------
# pallas_call wrapper
# --------------------------------------------------------------------------------------
def _attention_pallas(q, k, v, scale2):
    """q: (BH, C, T), k/v: (BH, C, S) channels-first -> (BH, C, T)."""
    BH, C, T = q.shape
    S = k.shape[2]
    itemsize = jnp.dtype(q.dtype).itemsize

    vmem_cap = _vmem_capacity_bytes()
    # Generation-aware tile budget: v7x has 64 MiB VMEM per TC, v5e/v6e have 128 MiB.
    budget = (24 << 20) if vmem_cap <= (64 << 20) else (48 << 20)
    tq, tk, bt = _choose_tiles(BH, T, S, C, itemsize, budget)

    # No wrapper-side padding: cdiv grids + masked writeback handle ragged head/q blocks,
    # and the in-kernel key mask (last S tile only) handles a ragged key block.
    grid = (pl.cdiv(BH, bt), pl.cdiv(T, tq), pl.cdiv(S, tk))
    mask_last = (S % tk) != 0

    kernel = functools.partial(_flash_attn_kernel, scale2=scale2,
                               s_valid=S, tk=tk, mask_last=mask_last)

    footprint = _kernel_vmem_bytes(bt, C, tq, tk, itemsize)
    vmem_limit = int(min(vmem_cap - (4 << 20),
                         max(2 * footprint + (4 << 20), 32 << 20)))

    return pl.pallas_call(
        kernel,
        out_shape=jax.ShapeDtypeStruct((BH, C, T), q.dtype),
        grid_spec=pltpu.PrefetchScalarGridSpec(
            num_scalar_prefetch=0,
            grid=grid,
            in_specs=[
                pl.BlockSpec((bt, C, tq), lambda b, t, s: (b, 0, t)),
                pl.BlockSpec((bt, C, tk), lambda b, t, s: (b, 0, s)),
                pl.BlockSpec((bt, C, tk), lambda b, t, s: (b, 0, s)),
            ],
            out_specs=pl.BlockSpec((bt, C, tq), lambda b, t, s: (b, 0, t)),
            scratch_shapes=[
                pltpu.VMEM((bt, C, tq), q.dtype),       # q * scale^2, resident over S
                pltpu.VMEM((bt, 1, tq), jnp.float32),   # running max  m
                pltpu.VMEM((bt, 1, tq), jnp.float32),   # running sum  l
                pltpu.VMEM((bt, C, tq), jnp.float32),   # un-normalized output
            ],
        ),
        compiler_params=pltpu.CompilerParams(
            dimension_semantics=("parallel", "parallel", "arbitrary"),
            vmem_limit_bytes=vmem_limit),
    )(q, k, v)


def qkv_cross_attention(qkv, n_heads, encoder_kv=None,
                        disable_self_attention=False):
    """JAX/Pallas equivalent of QKVCrossAttention.forward (channels-first throughout)."""
    bs, width, length = qkv.shape
    if disable_self_attention:
        ch = width // n_heads
        q = qkv.reshape(bs * n_heads, ch, length)
        k = v = None
    else:
        assert width % (3 * n_heads) == 0
        ch = width // (3 * n_heads)
        qkv_r = qkv.reshape(bs * n_heads, 3 * ch, length)
        q = qkv_r[:, :ch, :]
        k = qkv_r[:, ch:2 * ch, :]
        v = qkv_r[:, 2 * ch:, :]

    if encoder_kv is not None:
        assert encoder_kv.shape[1] == n_heads * ch * 2
        enc = encoder_kv.reshape(bs * n_heads, 2 * ch, -1)
        ek = enc[:, :ch, :]
        ev = enc[:, ch:, :]
        if disable_self_attention:
            k, v = ek, ev
        else:
            # TODO(synk): feed encoder and self k/v as two phases of the S grid axis
            # (clamped index_maps + in-kernel select) to avoid this HBM-materializing concat.
            k = jnp.concatenate([ek, k], axis=-1)   # enc first, matching torch.cat
            v = jnp.concatenate([ev, v], axis=-1)

    assert k is not None and v is not None, "need encoder_kv when self-attention is disabled"

    # scale^2 == 1/sqrt(ch) folded into q once inside the kernel (single f32 rounding;
    # exact for the f32 reference tolerance used below).
    scale = 1.0 / math.sqrt(math.sqrt(ch))
    a = _attention_pallas(q, k, v, scale * scale)    # (BH, C, T) — no transposes
    return a.reshape(bs, n_heads * ch, length)


# --------------------------------------------------------------------------------------
# Pure-JAX reference + self-test
# --------------------------------------------------------------------------------------
def _reference(qkv, n_heads, encoder_kv=None):
    """Pure-JAX reference mirroring the PyTorch forward (self-attn path)."""
    bs, width, length = qkv.shape
    ch = width // (3 * n_heads)
    qkv_r = qkv.reshape(bs * n_heads, 3 * ch, length)
    q, k, v = qkv_r[:, :ch], qkv_r[:, ch:2 * ch], qkv_r[:, 2 * ch:]
    if encoder_kv is not None:
        enc = encoder_kv.reshape(bs * n_heads, 2 * ch, -1)
        ek, ev = enc[:, :ch], enc[:, ch:]
        k = jnp.concatenate([ek, k], axis=-1)
        v = jnp.concatenate([ev, v], axis=-1)
    scale = 1.0 / math.sqrt(math.sqrt(ch))
    w = jnp.einsum('bct,bcs->bts', q * scale, k * scale)
    w = jax.nn.softmax(w.astype(jnp.float32), axis=-1).astype(w.dtype)
    a = jnp.einsum('bts,bcs->bct', w, v)
    return a.reshape(bs, -1, length)


if __name__ == "__main__":
    key = jax.random.PRNGKey(0)
    k1, k2 = jax.random.split(key)

    n_heads = 2
    ch = 8
    bs = 2
    T = 16        # query/self length
    T_enc = 8     # encoder length

    qkv = jax.random.normal(k1, (bs, n_heads * 3 * ch, T), dtype=jnp.float32)
    encoder_kv = jax.random.normal(k2, (bs, n_heads * 2 * ch, T_enc),
                                   dtype=jnp.float32)

    # self-attention only
    out_self = jax.block_until_ready(qkv_cross_attention(qkv, n_heads))
    ref_self = _reference(qkv, n_heads)
    assert out_self.shape == (bs, n_heads * ch, T)
    assert jnp.allclose(out_self, ref_self, atol=1e-5, rtol=1e-5)

    # cross-attention (encoder kv prepended to self kv)
    out_cross = jax.block_until_ready(
        qkv_cross_attention(qkv, n_heads, encoder_kv=encoder_kv))
    ref_cross = _reference(qkv, n_heads, encoder_kv=encoder_kv)
    assert out_cross.shape == (bs, n_heads * ch, T)
    assert jnp.allclose(out_cross, ref_cross, atol=1e-5, rtol=1e-5)

    print("KERNEL_OK")
</pallas_src>

<mosaic_0001>
module attributes {stable_mosaic.version = 11 : i64} {
  func.func @_flash_attn_kernel(%arg0: i32, %arg1: i32, %arg2: i32, %arg3: memref<2x8x16xf32, #tpu.memory_space<vmem>>, %arg4: memref<2x8x16xf32, #tpu.memory_space<vmem>>, %arg5: memref<2x8x16xf32, #tpu.memory_space<vmem>>, %arg6: memref<2x8x16xf32, #tpu.memory_space<vmem>>, %arg7: memref<2x8x16xf32, #tpu.memory_space<vmem>>, %arg8: memref<2x1x16xf32, #tpu.memory_space<vmem>>, %arg9: memref<2x1x16xf32, #tpu.memory_space<vmem>>, %arg10: memref<2x8x16xf32, #tpu.memory_space<vmem>>) attributes {dimension_semantics = [#tpu.dimension_semantics<parallel>, #tpu.dimension_semantics<parallel>, #tpu.dimension_semantics<arbitrary>], iteration_bounds = array<i64: 2, 1, 1>, scalar_prefetch = 0 : i64, scratch_operands = 4 : i64, tpu.core_type = #tpu.core_type<tc>, window_params = [{transform_indices = @transform_0, window_bounds = array<i64: 2, 8, 16>}, {transform_indices = @transform_1, window_bounds = array<i64: 2, 8, 16>}, {transform_indices = @transform_2, window_bounds = array<i64: 2, 8, 16>}, {transform_indices = @transform_3, window_bounds = array<i64: 2, 8, 16>}]} {
    %c0_i32 = arith.constant 0 : i32
    %0 = arith.cmpi eq, %arg2, %c0_i32 : i32
    %1 = arith.extui %0 : i1 to i32
    %c0_i32_0 = arith.constant 0 : i32
    %2 = arith.cmpi ne, %1, %c0_i32_0 : i32
    scf.if %2 {
      %c0_32 = arith.constant 0 : index
      %c0_33 = arith.constant 0 : index
      %c0_34 = arith.constant 0 : index
      %32 = vector.load %arg3[%c0_32, %c0_33, %c0_34] : memref<2x8x16xf32, #tpu.memory_space<vmem>>, vector<2x8x16xf32>
      %cst_35 = arith.constant 0.353553385 : f32
      %33 = vector.broadcast %cst_35 : f32 to vector<2x8x16xf32>
      %34 = arith.mulf %32, %33 : vector<2x8x16xf32>
      %c0_36 = arith.constant 0 : index
      %c0_37 = arith.constant 0 : index
      %c0_38 = arith.constant 0 : index
      %35 = vector.load %arg7[%c0_36, %c0_37, %c0_38] : memref<2x8x16xf32, #tpu.memory_space<vmem>>, vector<2x8x16xf32>
      tpu.vector_store %arg7[%c0_36, %c0_37, %c0_38], %34 {strides = array<i32>} : memref<2x8x16xf32, #tpu.memory_space<vmem>>, vector<2x8x16xf32>,
      %cst_39 = arith.constant 0xFF800000 : f32
      %36 = vector.broadcast %cst_39 : f32 to vector<2x1x16xf32>
      %c0_40 = arith.constant 0 : index
      %c0_41 = arith.constant 0 : index
      %c0_42 = arith.constant 0 : index
      %37 = vector.load %arg8[%c0_40, %c0_41, %c0_42] : memref<2x1x16xf32, #tpu.memory_space<vmem>>, vector<2x1x16xf32>
      tpu.vector_store %arg8[%c0_40, %c0_41, %c0_42], %36 {strides = array<i32>} : memref<2x1x16xf32, #tpu.memory_space<vmem>>, vector<2x1x16xf32>,
      %cst_43 = arith.constant 0.000000e+00 : f32
      %38 = vector.broadcast %cst_43 : f32 to vector<2x1x16xf32>
      %c0_44 = arith.constant 0 : index
      %c0_45 = arith.constant 0 : index
      %c0_46 = arith.constant 0 : index
      %39 = vector.load %arg9[%c0_44, %c0_45, %c0_46] : memref<2x1x16xf32, #tpu.memory_space<vmem>>, vector<2x1x16xf32>
      tpu.vector_store %arg9[%c0_44, %c0_45, %c0_46], %38 {strides = array<i32>} : memref<2x1x16xf32, #tpu.memory_space<vmem>>, vector<2x1x16xf32>,
      %cst_47 = arith.constant 0.000000e+00 : f32
      %40 = vector.broadcast %cst_47 : f32 to vector<2x8x16xf32>
      %c0_48 = arith.constant 0 : index
      %c0_49 = arith.constant 0 : index
      %c0_50 = arith.constant 0 : index
      %41 = vector.load %arg10[%c0_48, %c0_49, %c0_50] : memref<2x8x16xf32, #tpu.memory_space<vmem>>, vector<2x8x16xf32>
      tpu.vector_store %arg10[%c0_48, %c0_49, %c0_50], %40 {strides = array<i32>} : memref<2x8x16xf32, #tpu.memory_space<vmem>>, vector<2x8x16xf32>,
    } else {
    }
    %c0 = arith.constant 0 : index
    %c0_1 = arith.constant 0 : index
    %c0_2 = arith.constant 0 : index
    %3 = vector.load %arg4[%c0, %c0_1, %c0_2] : memref<2x8x16xf32, #tpu.memory_space<vmem>>, vector<2x8x16xf32>
    %c0_3 = arith.constant 0 : index
    %c0_4 = arith.constant 0 : index
    %c0_5 = arith.constant 0 : index
    %4 = vector.load %arg7[%c0_3, %c0_4, %c0_5] : memref<2x8x16xf32, #tpu.memory_space<vmem>>, vector<2x8x16xf32>
    %cst = arith.constant dense<0.000000e+00> : vector<2x16x16xf32>
    %5 = tpu.matmul %3, %4, %cst {dimension_numbers = #tpu.dot_dimension_numbers<[1], [1], [2], [2], [0, 0, 0, 2, 1, 2], [0], [0]>} : vector<2x8x16xf32>, vector<2x8x16xf32>, vector<2x16x16xf32> -> vector<2x16x16xf32>
    %c0_6 = arith.constant 0 : index
    %c0_7 = arith.constant 0 : index
    %c0_8 = arith.constant 0 : index
    %6 = vector.load %arg8[%c0_6, %c0_7, %c0_8] : memref<2x1x16xf32, #tpu.memory_space<vmem>>, vector<2x1x16xf32>
    %cst_9 = arith.constant dense<0xFF800000> : vector<2x16xf32>
    %7 = vector.multi_reduction <maximumf>, %5, %cst_9 [1] : vector<2x16x16xf32> to vector<2x16xf32>
    %8 = vector.shape_cast %7 : vector<2x16xf32> to vector<2x1x16xf32>
    %9 = arith.maximumf %6, %8 : vector<2x1x16xf32>
    %10 = arith.subf %6, %9 : vector<2x1x16xf32>
    %11 = math.exp %10 : vector<2x1x16xf32>
    %12 = vector.broadcast %9 : vector<2x1x16xf32> to vector<2x16x16xf32>
    %13 = arith.subf %5, %12 : vector<2x16x16xf32>
    %14 = math.exp %13 : vector<2x16x16xf32>
    %c0_10 = arith.constant 0 : index
    %c0_11 = arith.constant 0 : index
    %c0_12 = arith.constant 0 : index
    %15 = vector.load %arg9[%c0_10, %c0_11, %c0_12] : memref<2x1x16xf32, #tpu.memory_space<vmem>>, vector<2x1x16xf32>
    %16 = arith.mulf %11, %15 : vector<2x1x16xf32>
    %cst_13 = arith.constant dense<0.000000e+00> : vector<2x16xf32>
    %17 = vector.multi_reduction <add>, %14, %cst_13 [1] : vector<2x16x16xf32> to vector<2x16xf32>
    %18 = vector.shape_cast %17 : vector<2x16xf32> to vector<2x1x16xf32>
    %19 = arith.addf %16, %18 : vector<2x1x16xf32>
    %c0_14 = arith.constant 0 : index
    %c0_15 = arith.constant 0 : index
    %c0_16 = arith.constant 0 : index
    %20 = vector.load %arg9[%c0_14, %c0_15, %c0_16] : memref<2x1x16xf32, #tpu.memory_space<vmem>>, vector<2x1x16xf32>
    tpu.vector_store %arg9[%c0_14, %c0_15, %c0_16], %19 {strides = array<i32>} : memref<2x1x16xf32, #tpu.memory_space<vmem>>, vector<2x1x16xf32>,
    %c0_17 = arith.constant 0 : index
    %c0_18 = arith.constant 0 : index
    %c0_19 = arith.constant 0 : index
    %21 = vector.load %arg5[%c0_17, %c0_18, %c0_19] : memref<2x8x16xf32, #tpu.memory_space<vmem>>, vector<2x8x16xf32>
    %cst_20 = arith.constant dense<0.000000e+00> : vector<2x8x16xf32>
    %22 = tpu.matmul %21, %14, %cst_20 {dimension_numbers = #tpu.dot_dimension_numbers<[2], [1], [1], [2], [0, 0, 0, 1, 1, 2], [0], [0]>} : vector<2x8x16xf32>, vector<2x16x16xf32>, vector<2x8x16xf32> -> vector<2x8x16xf32>
    %c0_21 = arith.constant 0 : index
    %c0_22 = arith.constant 0 : index
    %c0_23 = arith.constant 0 : index
    %23 = vector.load %arg10[%c0_21, %c0_22, %c0_23] : memref<2x8x16xf32, #tpu.memory_space<vmem>>, vector<2x8x16xf32>
    %24 = vector.broadcast %11 : vector<2x1x16xf32> to vector<2x8x16xf32>
    %25 = arith.mulf %24, %23 : vector<2x8x16xf32>
    %26 = arith.addf %25, %22 : vector<2x8x16xf32>
    %c0_24 = arith.constant 0 : index
    %c0_25 = arith.constant 0 : index
    %c0_26 = arith.constant 0 : index
    %27 = vector.load %arg10[%c0_24, %c0_25, %c0_26] : memref<2x8x16xf32, #tpu.memory_space<vmem>>, vector<2x8x16xf32>
    tpu.vector_store %arg10[%c0_24, %c0_25, %c0_26], %26 {strides = array<i32>} : memref<2x8x16xf32, #tpu.memory_space<vmem>>, vector<2x8x16xf32>,
    %c0_27 = arith.constant 0 : index
    %c0_28 = arith.constant 0 : index
    %c0_29 = arith.constant 0 : index
    %28 = vector.load %arg8[%c0_27, %c0_28, %c0_29] : memref<2x1x16xf32, #tpu.memory_space<vmem>>, vector<2x1x16xf32>
    tpu.vector_store %arg8[%c0_27, %c0_28, %c0_29], %9 {strides = array<i32>} : memref<2x1x16xf32, #tpu.memory_space<vmem>>, vector<2x1x16xf32>,
    %c0_i32_30 = arith.constant 0 : i32
    %29 = arith.cmpi eq, %arg2, %c0_i32_30 : i32
    %30 = arith.extui %29 : i1 to i32
    %c0_i32_31 = arith.constant 0 : i32
    %31 = arith.cmpi ne, %30, %c0_i32_31 : i32
    scf.if %31 {
      %c0_32 = arith.constant 0 : index
      %c0_33 = arith.constant 0 : index
      %c0_34 = arith.constant 0 : index
      %32 = vector.load %arg9[%c0_32, %c0_33, %c0_34] : memref<2x1x16xf32, #tpu.memory_space<vmem>>, vector<2x1x16xf32>
      %33 = tpu.reciprocal %32 : vector<2x1x16xf32> -> vector<2x1x16xf32>
      %c0_35 = arith.constant 0 : index
      %c0_36 = arith.constant 0 : index
      %c0_37 = arith.constant 0 : index
      %34 = vector.load %arg10[%c0_35, %c0_36, %c0_37] : memref<2x8x16xf32, #tpu.memory_space<vmem>>, vector<2x8x16xf32>
      %35 = vector.broadcast %33 : vector<2x1x16xf32> to vector<2x8x16xf32>
      %36 = arith.mulf %34, %35 : vector<2x8x16xf32>
      %c0_38 = arith.constant 0 : index
      %c0_39 = arith.constant 0 : index
      %c0_40 = arith.constant 0 : index
      %37 = vector.load %arg6[%c0_38, %c0_39, %c0_40] : memref<2x8x16xf32, #tpu.memory_space<vmem>>, vector<2x8x16xf32>
      tpu.vector_store %arg6[%c0_38, %c0_39, %c0_40], %36 {strides = array<i32>} : memref<2x8x16xf32, #tpu.memory_space<vmem>>, vector<2x8x16xf32>,
    } else {
    }
    return
  }
  func.func @transform_0(%arg0: i32, %arg1: i32, %arg2: i32) -> (i32, i32, i32) {
    %c0_i32 = arith.constant 0 : i32
    %c0_i32_0 = arith.constant 0 : i32
    return %arg0, %c0_i32, %arg1 : i32, i32, i32
  }
  func.func @transform_1(%arg0: i32, %arg1: i32, %arg2: i32) -> (i32, i32, i32) {
    %c0_i32 = arith.constant 0 : i32
    %c0_i32_0 = arith.constant 0 : i32
    return %arg0, %c0_i32, %arg2 : i32, i32, i32
  }
  func.func @transform_2(%arg0: i32, %arg1: i32, %arg2: i32) -> (i32, i32, i32) {
    %c0_i32 = arith.constant 0 : i32
    %c0_i32_0 = arith.constant 0 : i32
    return %arg0, %c0_i32, %arg2 : i32, i32, i32
  }
  func.func @transform_3(%arg0: i32, %arg1: i32, %arg2: i32) -> (i32, i32, i32) {
    %c0_i32 = arith.constant 0 : i32
    %c0_i32_0 = arith.constant 0 : i32
    return %arg0, %c0_i32, %arg1 : i32, i32, i32
  }
}

</mosaic_0001>

<bundles_post_ra>
// kernel: tpu_custom_call.1
= control target key start
LH: loop header
LB: loop body
LE: loop exit
PB: predicated region body
PF: predicated region fallthrough
CT: control target
= control target key end

     0   :  { %s1673_s0 = inlined_call_operand.hbm [shape: f32[4,8,16], index: 0, kind: input, shape index: {}]   ;;  %s1674_s1 = inlined_call_operand.hbm [shape: f32[4,8,16], index: 1, kind: input, shape index: {}]   ;;  %s1675_s2 = inlined_call_operand.hbm [shape: f32[4,8,16], index: 2, kind: input, shape index: {}]   ;;  %s1676_s3 = inlined_call_operand.hbm [shape: f32[4,8,16], index: 3, kind: output, shape index: {}]  }
   0x1   :  { %1686 = sst [smem:[#allocation19_spill]] %s1674_s1 }
   0x2   :  { %8 = vsyncpa [#allocation7], 0 }
   0x3   :  { %10 = vsyncpa [#allocation7 + $0x1], 0 }
   0x4   :  { %11 = vsyncpa [#allocation10], 0 }
   0x5   :  { %13 = vsyncpa [#allocation10 + $0x1], 0 }
   0x6   :  { %14 = vsyncpa [#allocation8], 0 }
   0x7   :  { %16 = vsyncpa [#allocation8 + $0x1], 0  ;;  %s1355_s12 = smov 0   ;;  %s1357_s13 = smov 0  }
   0x8   :  { %s1359_s14 = smov 0   ;;  %s1361_s15 = smov 0  }
   0x9   :  { %s1363_s16 = smov 0   ;;  %s1365_s17 = smov 0  }
   0xa LB: > { %1687 = sst [smem:[#allocation16_spill]] %s1317_s16  ;;  %s1386_s18 = sadd.s32 4294967295, %s1321_s17   ;;  %s1321_s17 = sphi %s1365_s17, %s22_s17   ;;  %s1317_s16 = sphi %s1363_s16, %s1710_s16   ;;  %s1313_s15 = sphi %s1361_s15, %s1709_s15   ;;  %s1309_s14 = sphi %s1359_s14, %s1713_s14   ;;  %s1305_s13 = sphi %s1357_s13, %s1712_s13   ;;  %s1301_s12 = sphi %s1355_s12, %s1711_s12  }
   0xb   : > { %s975_s19 = sadd.s32 4294967294, %s1321_s17   ;;  %s41_s20 = sadd.s32 1, %s1317_s16 }
   0xc   : > { %s50_s21 = sadd.s32 1, %s1309_s14  ;;  %p43_p0 = scmp.ge.s32.totalorder %s41_s20, 2 }
   0xd   : > { %p57_p1 = scmp.ne.s32.totalorder %s1309_s14, %s1305_s13  ;;  %p58_p2 = scmp.eq.s32.totalorder %s1321_s17, 0 }
   0xe   : > { %p63_p3 = scmp.ne.s32.totalorder %s1305_s13, %s1301_s12  ;;  %s1715_s20 = smov (%p43_p0, %s41_s20), 0 }
   0xf   : > { %1688 = sst [smem:[#allocation17_spill]] %s1715_s20  ;;  %p1398_p4 = por %p58_p2, %p57_p1 }
  0x10   : > { %p64_p5 = scmp.eq.s32.totalorder %s1386_s18, 0  ;;  %s45_s23 = ssub.s32 %s1317_s16, %s1715_s20 }
  0x11   : > { %p145_p6 = scmp.eq.s32.totalorder %s1386_s18, 1  ;;  %p48_p7 = scmp.eq.s32.totalorder %s45_s23, 0 }
  0x12   : > { %p1406_p8 = por %p64_p5, %p63_p3  ;;  %p151_p10 = scmp.eq.s32.totalorder %s975_s19, 1 }
  0x13   : > { %p1410_p9 = por %p145_p6, %p57_p1  ;;  %p1071_p13 = scmp.lt.s32.totalorder %s1321_s17, 2 }
  0x14   : > { %s1690_s24 = scalar_select %p1406_p8, 1, 0 }
  0x15   : > { %s1691_s25 = scalar_select %p1410_p9, 1, 0 }
  0x16   : > { %s1415_s26 = scalar_select %p48_p7, %s1309_s14, %s50_s21  }
  0x17   : > { %p1417_p11 = por %p151_p10, %p63_p3  ;;  %s1679_s28 = sand.u32 1, %s1309_s14  }
  0x18   : > { %1692 = sst [smem:[#allocation18_spill]] %s1415_s26  ;;  %s1426_s29 = sshll.u32 %s1679_s28, 4 }
  0x19   : > { %s1693_s27 = scalar_select %p1417_p11, 1, 0 }
  0x1a   : > { %s1429_s30 = sshll.u32 %s1317_s16, 8  ;;  %p1433_p0 = pnand %p1071_p13, %p1398_p4 }
  0x1b   : > { %s193_s5 = sand.u32 1, %s1321_s17   ;;  %s1695_s1 = sld [smem:[#allocation19_spill]] }
  0x1c   : > { %s197_s9 = scalar_lea.vmem [#allocation9], %s1426_s29  ;;  %s1449_s11 = scalar_lea.sflag [#allocation10], %s193_s5 }
  0x1d   : > { %s205_s10 = sshll.u32 %s197_s9, 4  ;;  %p1455_p4 = pneg %p1433_p0  ;;  %s1446_s10 = int_to_ptr.vmem [resolvable:$true] %s205_s10 }
  0x21   : > { %s1442_s8 = scalar_lea.hbm %s1695_s1, %s1429_s30  ;;  %s1150_s6 = scalar_lea.hbm %s1695_s1, 512 }
  0x22   : > { %s1145_s19 = scalar_lea.hbm %s1442_s8, 256  ;;  %p1151_p7 = scmp.lt.u32.totalorder %s1442_s8, %s1695_s1 }
  0x23   : > { %p1146_p3 = scmp.ne.s32.totalorder %s1442_s8, %s1145_s19  ;;  %p1152_p10 = scmp.lt.u32.totalorder %s1150_s6, %s1145_s19 }
  0x24   : > { %p1154_p12 = scmp.lt.u32.totalorder %s1145_s19, %s1442_s8 }
  0x25   : > { %p1148_p5 = pnand %p1455_p4, %p1146_p3  ;;  %p1153_p13 = por %p1152_p10, %p1151_p7 }
  0x27   : > { %p1149_p6 = pneg %p1148_p5  ;;  %p1155_p1 = por %p1154_p12, %p1153_p13 }
  0x29   : > { %p1156_p2 = pnand %p1155_p1, %p1149_p6 }
  0x2b   : > { %1159 = shalt.err (!%p1156_p2)
}
  0x2c   : > { %s1160_s5 = scalar_lea.vmem %s1446_s10, 256  ;;  %s1323_s22 = smov [#allocation9]  }
  0x2d   : > { %p1161_p3 = scmp.ne.s32.totalorder %s1446_s10, %s1160_s5  ;;  %s1165_s23 = sshll.u32 %s1323_s22, 4  ;;  %s1166_s23 = int_to_ptr.vmem [resolvable:$false] %s1165_s23 }
  0x2e   : > { %s1167_s7 = scalar_lea.vmem %s1166_s23, 512  ;;  %p1168_p9 = scmp.lt.s32.totalorder %s1446_s10, %s1166_s23 }
  0x2f   : > { %p1163_p5 = pnand %p1161_p3, %p1455_p4  ;;  %p1169_p8 = scmp.lt.s32.totalorder %s1167_s7, %s1160_s5 }
  0x31   : > { %p1164_p11 = pneg %p1163_p5  ;;  %p1170_p7 = por %p1169_p8, %p1168_p9 }
  0x33   : > { %p1171_p10 = pnand %p1170_p7, %p1164_p11 }
  0x35   : > { %1174 = shalt.err (!%p1171_p10)
}
  0x36   : > { %s1680_s19 = smov 128   ;;  %s1682_s6 = smov 8  }
  0x37   : > { %1063 = dma.hbm_to_vmem [thread:$0]  (!%p1433_p0), %s1442_s8, 256, %s1446_s10, %s1449_s11, %s1680_s19, %s1680_s19, %s1682_s6  }
  0x38   : > { %p1697_p8 = scmp.lt.s32.totalorder %s1321_s17, 3  ;;  %p1698_p9 = scmp.ge.s32.totalorder %s1321_s17, 1 }
  0x39   : > { %s1494_s23 = scalar_lea.hbm %s1673_s0, %s1429_s30  ;;  %s175_s7 = scalar_lea.vmem [#allocation6], %s1426_s29 }
  0x3a   : > { %p1486_p11 = pnand %p1698_p9, %p1697_p8  ;;  %s183_s28 = sshll.u32 %s175_s7, 4  ;;  %s1497_s28 = int_to_ptr.vmem [resolvable:$true] %s183_s28 }
  0x3b   : > { %s1503_s19 = scalar_lea.hbm %s1675_s2, %s1429_s30  ;;  %s1700_s6 = sand.u32 1, %s1309_s14  }
  0x3c   : > { %s1699_s9 = scalar_select %p1486_p11, 1, 0 }
  0x3d   : > { %s1507_s1 = scalar_lea.sflag [#allocation7], %s1700_s6  ;;  %s1175_s20 = scalar_lea.hbm %s1494_s23, 256 }
  0x3e   : > { %p1176_p12 = scmp.ne.s32.totalorder %s1494_s23, %s1175_s20  ;;  %s1180_s16 = scalar_lea.hbm %s1673_s0, 512 }
  0x3f   : > { %p1181_p6 = scmp.lt.u32.totalorder %s1494_s23, %s1673_s0  ;;  %p1182_p13 = scmp.lt.u32.totalorder %s1180_s16, %s1175_s20 }
  0x40   : > { %p1178_p1 = pnand %p1176_p12, %p1455_p4  ;;  %p1184_p5 = scmp.lt.u32.totalorder %s1175_s20, %s1494_s23 }
  0x41   : > { %p1183_p3 = por %p1182_p13, %p1181_p6 }
  0x42   : > { %p1179_p2 = pneg %p1178_p1 }
  0x43   : > { %p1185_p7 = por %p1184_p5, %p1183_p3 }
  0x45   : > { %p1186_p10 = pnand %p1185_p7, %p1179_p2 }
  0x47   : > { %1189 = shalt.err (!%p1186_p10)
}
  0x48   : > { %s1190_s30 = scalar_lea.vmem %s1497_s28, 256  ;;  %s1326_s6 = smov [#allocation6]  }
  0x49   : > { %p1191_p8 = scmp.ne.s32.totalorder %s1497_s28, %s1190_s30  ;;  %s1195_s8 = sshll.u32 %s1326_s6, 4  ;;  %s1196_s8 = int_to_ptr.vmem [resolvable:$false] %s1195_s8 }
  0x4a   : > { %s1197_s26 = scalar_lea.vmem %s1196_s8, 512  ;;  %p1198_p1 = scmp.lt.s32.totalorder %s1497_s28, %s1196_s8 }
  0x4b   : > { %p1193_p9 = pnand %p1191_p8, %p1455_p4  ;;  %p1199_p11 = scmp.lt.s32.totalorder %s1197_s26, %s1190_s30 }
  0x4d   : > { %p1194_p12 = pneg %p1193_p9  ;;  %p1200_p6 = por %p1199_p11, %p1198_p1 }
  0x4f   : > { %p1201_p13 = pnand %p1200_p6, %p1194_p12 }
  0x51   : > { %1204 = shalt.err (!%p1201_p13)
}
  0x52   : > { %s1701_s16 = smov 8   ;;  %s1702_s20 = smov 128  }
  0x53   : > { %1060 = dma.hbm_to_vmem [thread:$0]  (!%p1433_p0), %s1494_s23, 256, %s1497_s28, %s1507_s1, %s1702_s20, %s1702_s20, %s1701_s16  }
  0x54   : > { %s219_s10 = scalar_lea.vmem [#allocation11], %s1426_s29  ;;  %s1205_s22 = scalar_lea.hbm %s1503_s19, 256 }
  0x55   : > { %s227_s5 = sshll.u32 %s219_s10, 4  ;;  %p1206_p11 = scmp.ne.s32.totalorder %s1503_s19, %s1205_s22  ;;  %s1535_s5 = int_to_ptr.vmem [resolvable:$true] %s227_s5 }
  0x56   : > { %s1210_s6 = scalar_lea.hbm %s1675_s2, 512  ;;  %p1211_p5 = scmp.lt.u32.totalorder %s1503_s19, %s1675_s2 }
  0x57   : > { %p1208_p2 = pnand %p1206_p11, %p1455_p4  ;;  %p1212_p7 = scmp.lt.u32.totalorder %s1210_s6, %s1205_s22 }
  0x58   : > { %p1214_p8 = scmp.lt.u32.totalorder %s1205_s22, %s1503_s19 }
  0x59   : > { %p1209_p3 = pneg %p1208_p2  ;;  %p1213_p10 = por %p1212_p7, %p1211_p5 }
  0x5b   : > { %p1215_p9 = por %p1214_p8, %p1213_p10 }
  0x5d   : > { %p1216_p12 = pnand %p1215_p9, %p1209_p3 }
  0x5f   : > { %1219 = shalt.err (!%p1216_p12)
}
  0x60   : > { %s1220_s1 = scalar_lea.vmem %s1535_s5, 256  ;;  %s1327_s28 = smov [#allocation11]  }
  0x61   : > { %p1221_p1 = scmp.ne.s32.totalorder %s1535_s5, %s1220_s1  ;;  %s1225_s29 = sshll.u32 %s1327_s28, 4  ;;  %s1226_s29 = int_to_ptr.vmem [resolvable:$false] %s1225_s29 }
  0x62   : > { %s1227_s23 = scalar_lea.vmem %s1226_s29, 512  ;;  %p1228_p11 = scmp.lt.s32.totalorder %s1535_s5, %s1226_s29 }
  0x63   : > { %p1223_p6 = pnand %p1221_p1, %p1455_p4  ;;  %p1229_p2 = scmp.lt.s32.totalorder %s1227_s23, %s1220_s1 }
  0x65   : > { %p1224_p13 = pneg %p1223_p6  ;;  %p1230_p5 = por %p1229_p2, %p1228_p11 }
  0x67   : > { %p1231_p7 = pnand %p1230_p5, %p1224_p13 }
  0x69   : > { %1234 = shalt.err (!%p1231_p7)
}
  0x6a   : > { %1066 = dma.hbm_to_vmem [thread:$0]  (!%p1433_p0), %s1503_s19, 256, %s1535_s5, %s1449_s11, %s1702_s20, %s1702_s20, %s1701_s16  }
  0x6b   : > { %p1703_p4 = scmp.ne.s32.totalorder %s1699_s9, 0 }
  0x6c   : > { %s1565_s21 = sand.u32 (!%p1703_p4), 1, %s1305_s13   ;;  %p1704_p3 = scmp.ne.s32.totalorder (!%p1703_p4), %s1690_s24, 0 }
  0x6d   : > { %239 = sbr.rel (%p1703_p4) target bundleno = 754 (0x2f2), region = 32  ;;  %s1568_s10 = sshll.u32 (!%p1703_p4), %s1565_s21, 4 }
  0x6e   : > { %s242_s4 = scalar_lea.sflag (!%p1703_p4), [#allocation7], %s1565_s21  ;;  %s245_s22 = scalar_lea.vmem (!%p1703_p4), [#allocation6], %s1568_s10 }
  0x74   : > { %1288 = dma.done.wait (%p1704_p3), %s242_s4, 256  }
  0x75   : > { %1290 = vsyncadd (%p1704_p3), %s242_s4, 4294967040  ;;  %s250_s11 = sand.u32 1, %s1386_s18   ;;  %s254_s9 = scalar_lea.vmem [#allocation9], %s1568_s10 }
  0x76   : > { %s251_s19 = scalar_lea.sflag [#allocation10], %s250_s11 }
  0x77   : > { %1292 = dma.done.wait (%p1704_p3), %s251_s19, 512  }
  0x78   : > { %1294 = vsyncadd (%p1704_p3), %s251_s19, 4294966784  ;;  %v318_v0 = vld [vmem:[%s254_s9] sm:$0xff]  ;;  %vm308_vm0 = vcmask 130048   ;;  %v305_v3 = vld [vmem:[%s245_s22 + $0x8] sm:$0xff]  ;;  %vm354_vm1 = vcmask 64512   ;;  %vm311_vm2 = vcmask 122880   ;;  %v580_v22 = vlaneseq }
  0x79   : > { %v304_v1 = vld [vmem:[%s245_s22] sm:$0xff]  ;;  %322 = vxpose.xlu0.b32.start.end [1/1] (short) (narrow) %v318_v0, 16  ;;  %v307_v4 = vmul.f32 0.35355338, %v305_v3  ;;  %v319_v5 = vld [vmem:[%s254_s9 + $0x8] sm:$0xff]  ;;  %v1328_v12 = vmov -inf  }
  0x7a   : > { %v306_v2 = vmul.f32 0.35355338, %v304_v1  ;;  %312 = vst.msk [vmem:[#allocation3] sm:$0x1] %vm311_vm2, %v1328_v12  ;;  %313 = vst.msk [vmem:[#allocation3 + $0x1] sm:$0x1] %vm311_vm2, %v1328_v12 }
  0x7b   : > { %310 = vst.msk [vmem:[#allocation2 + $0x8] sm:$0xff] %vm308_vm0, %v307_v4  ;;  %v1329_v13 = vmov 0.0   ;;  %v1330_v14 = vmov 0.0|0.0   ;;  %vm1331_vm3 = vmmov 0   ;;  %v581_v29 = vshrl.u32 %v580_v22, 7  ;;  %s263_s18 = scalar_lea.vmem [#allocation11], %s1568_s10 }
  0x7c   : > { %309 = vst.msk [vmem:[#allocation2] sm:$0xff] %vm308_vm0, %v306_v2  ;;  %316 = vst.msk [vmem:[#allocation5] sm:$0xff] %vm308_vm0, %v1329_v13  ;;  %v629_v2 = vld [vmem:[%s263_s18] sm:$0xff]  ;;  %s295_s24 = scalar_lea.vmem [#allocation12], %s1568_s10  ;;  %s1006_s16 = sshll.u32 %s1313_s15, 8 }
  0x7d   : > { %314 = vst.msk [vmem:[#allocation4] sm:$0x1] %vm311_vm2, %v1329_v13  ;;  %315 = vst.msk [vmem:[#allocation4 + $0x1] sm:$0x1] %vm311_vm2, %v1329_v13  ;;  %v1594_v35 = vsub.s32 0, %v581_v29  ;;  %s839_s20 = sshll.u32 %s295_s24, 4  ;;  %s1621_s30 = scalar_lea.hbm %s1676_s3, %s1006_s16  ;;  %s1623_s20 = int_to_ptr.vmem [resolvable:$true] %s839_s20 }
  0x7e   : > { %436 = vxpose.xlu0.b32.start.end [1/1] (short) (narrow) %v319_v5, 16  ;;  %317 = vst.msk [vmem:[#allocation5 + $0x8] sm:$0xff] %vm308_vm0, %v1329_v13  ;;  %s825_s6 = scalar_lea.sflag [#allocation8], %s1565_s21  ;;  %s1235_s8 = scalar_lea.vmem %s1623_s20, 256 }
  0x7f   : > { %p1236_p0 = scmp.ne.s32.totalorder %s1623_s20, %s1235_s8  ;;  %p1705_p10 = scmp.ne.s32.totalorder %s1691_s25, 0 }
  0x80   : > { %s1332_s15 = smov [#allocation12]  }
  0x81   : > { %v549_v33 = vld [vmem:[#allocation3] sm:$0x1]  ;;  %v550_v46 = vld [vmem:[#allocation3 + $0x1] sm:$0x1]  ;;  %p1237_p8 = pnand %p1236_p0, %p1705_p10  ;;  %s1239_s26 = sshll.u32 %s1332_s15, 4  ;;  %s1240_s26 = int_to_ptr.vmem [resolvable:$false] %s1239_s26 }
  0x82   : > { %v321_v7 = vld [vmem:[#allocation2 + $0x8] sm:$0xff]  ;;  %s1241_s1 = scalar_lea.vmem %s1240_s26, 512  ;;  %p1242_p12 = scmp.lt.s32.totalorder %s1623_s20, %s1240_s26 }
  0x83   : > { %v320_v6 = vld [vmem:[#allocation2] sm:$0xff]  ;;  %1024 = vmatprep.subr.mxu1 %v321_v7  ;;  %p1238_p9 = pneg %p1237_p8  ;;  %p1243_p1 = scmp.lt.s32.totalorder %s1241_s1, %s1235_s8 }
  0x84   : > { %1019 = vmatprep.subr.mxu0 %v320_v6  ;;  %1025 = vmatpush3.msra.mxu1 %v321_v7 }
  0x85   : > { %1020 = vmatpush3.msra.mxu0 %v320_v6  ;;  %1046 = vmatprep.subr.bf16.mxu1 %v1330_v14  ;;  %p1244_p6 = por %p1243_p1, %p1242_p12 }
  0x86   : > { %1043 = vmatprep.subr.bf16.mxu0 %v1330_v14 }
  0x87   : > { %p1245_p13 = pnand %p1244_p6, %p1238_p9 }
  0xf9   : > { %v338_v8 = vpop.trf.xlu0 }
  0xfa   : > { %1021 = vmatprep.mubr.msk.f32.mxu0 %vm354_vm1, %v338_v8 }
  0xfd   : > { %v339_v9 = vpop.trf.xlu0 }
  0xfe   : > { %1022 = vmatmul.mubr.msk.f32.vlgmr.msra.gmra.mrb[0].mxu0 %vm354_vm1, %v339_v9 }
  0xff   : > { %1033 = vmatprep.mubr.msk.f32.mxu0 %vm1331_vm3, %v1329_v13 }
 0x101   : > { %v452_v10 = vpop.trf.xlu0 }
 0x102   : > { %1026 = vmatprep.mubr.msk.f32.mxu1 %vm354_vm1, %v452_v10 }
 0x105   : > { %v453_v11 = vpop.trf.xlu0 }
 0x106   : > { %1027 = vmatmul.mubr.msk.f32.vlgmr.msra.gmra.mrb[0].mxu1 %vm354_vm1, %v453_v11 }
 0x107   : > { %1040 = vmatprep.mubr.msk.f32.mxu1 %vm1331_vm3, %v1329_v13 }
 0x1d1   : > { %v1023_v15 = vpop.f32.mrb[0].mxu0 }
 0x1d2   : > { %v553_v16 = vsel %vm308_vm0, %v1023_v15, -inf  ;;  %v427_v17 = vpop.f32.mrb[1].mxu0 }
 0x1d3   : > { %v552_v18 = vsel %vm308_vm0, %v427_v17, -inf }
 0x1d4   : > { %v554_v19 = vmax.f32 %v552_v18, %v553_v16  ;;  %v630_v16 = vld [vmem:[%s263_s18 + $0x8] sm:$0xff] }
 0x1d6   : > { %v555_v20 = vrot.slane %v554_v19, 4 }
 0x1d8   : > { %v556_v21 = vmax.f32 %v554_v19, %v555_v20 }
 0x1d9   : > { %v1028_v23 = vpop.f32.mrb[0].mxu1 }
 0x1da   : > { %v557_v24 = vrot.slane %v556_v21, 2  ;;  %v562_v25 = vsel %vm308_vm0, %v1028_v23, -inf  ;;  %v540_v26 = vpop.f32.mrb[1].mxu1 }
 0x1db   : > { %v561_v27 = vsel %vm308_vm0, %v540_v26, -inf }
 0x1dc   : > { %v558_v28 = vmax.f32 %v556_v21, %v557_v24  ;;  %v563_v30 = vmax.f32 %v561_v27, %v562_v25  ;;  %v603_v25 = vld [vmem:[#allocation4 + $0x1] sm:$0x1] }
 0x1de   : > { %v559_v31 = vrot.slane %v558_v28, 1  ;;  %v564_v32 = vrot.slane %v563_v30, 4 }
 0x1e0   : > { %v560_v34 = vmax.f32 %v558_v28, %v559_v31  ;;  %v565_v36 = vmax.f32 %v563_v30, %v564_v32  ;;  %v777_v31 = vld [vmem:[#allocation5] sm:$0xff] }
 0x1e2   : > { %v570_v37 = vmax.f32 %v549_v33, %v560_v34  ;;  %v566_v38 = vrot.slane %v565_v36, 2 }
 0x1e4   : > { %v572_v39 = vsub.f32 %v549_v33, %v570_v37  ;;  %v583_v40 = vrot.slane %v570_v37, %v1594_v35  ;;  %797 = vst.msk [vmem:[#allocation3] sm:$0x1] %vm311_vm2, %v570_v37  ;;  %v567_v41 = vmax.f32 %v565_v36, %v566_v38  ;;  %v778_v38 = vld [vmem:[#allocation5 + $0x8] sm:$0xff] }
 0x1e6   : > { %v574_v42 = vmul.f32 1.442695, %v572_v39  ;;  %v590_v43 = vsub.f32 %v427_v17, %v583_v40  ;;  %v591_v44 = vsub.f32 %v1023_v15, %v583_v40  ;;  %v568_v45 = vrot.slane %v567_v41, 1  ;;  %v602_v15 = vld [vmem:[#allocation4] sm:$0x1] }
 0x1e8   : > { %1129 = vpow2.f32 %v574_v42  ;;  %v594_v47 = vmul.f32 1.442695, %v590_v43  ;;  %v596_v48 = vmul.f32 1.442695, %v591_v44  ;;  %v569_v49 = vmax.f32 %v567_v41, %v568_v45 }
 0x1ea   : > { %1131 = vpow2.f32 %v594_v47  ;;  %v571_v50 = vmax.f32 %v550_v46, %v569_v49 }
 0x1eb   : > { %1133 = vpow2.f32 %v596_v48 }
 0x1ec   : > { %v573_v51 = vsub.f32 %v550_v46, %v571_v50  ;;  %v587_v52 = vrot.slane %v571_v50, %v1594_v35  ;;  %798 = vst.msk [vmem:[#allocation3 + $0x1] sm:$0x1] %vm311_vm2, %v571_v50 }
 0x1ee   : > { %v576_v53 = vmul.f32 1.442695, %v573_v51  ;;  %v592_v54 = vsub.f32 %v540_v26, %v587_v52  ;;  %v593_v55 = vsub.f32 %v1028_v23, %v587_v52 }
 0x1f0   : > { %1135 = vpow2.f32 %v576_v53  ;;  %v598_v56 = vmul.f32 1.442695, %v592_v54  ;;  %v600_v57 = vmul.f32 1.442695, %v593_v55 }
 0x1f2   : > { %v1130_v58 = vpop.eup %1129  ;;  %1137 = vpow2.f32 %v598_v56 }
 0x1f3   : > { %1139 = vpow2.f32 %v600_v57  ;;  %v784_v59 = vrot.slane %v1130_v58, %v1594_v35  ;;  %v604_v21 = vmul.f32 %v1130_v58, %v602_v15 }
 0x1f4   : > { %v1132_v60 = vpop.eup %1131 }
 0x1f5   : > { %v1134_v61 = vpop.eup %1133  ;;  %v606_v62 = vsel %vm308_vm0, %v1132_v60, 0.0  ;;  %v791_v32 = vmul.f32 %v784_v59, %v777_v31 }
 0x1f6   : > { %v607_v63 = vsel %vm308_vm0, %v1134_v61, 0.0  ;;  %v1044_v0 = vpack.c.bf16 %v1134_v61, %v1132_v60 }
 0x1f7   : > { %v608_v1 = vadd.f32 %v607_v63, %v606_v62 }
 0x1f8   : > { %1045 = vmatpush3.bf16.msra.mxu0 %v1044_v0 }
 0x1f9   : > { %v609_v3 = vrot.slane %v608_v1, 4 }
 0x1fa   : > { %v1136_v4 = vpop.eup %1135 }
 0x1fb   : > { %v610_v5 = vadd.f32 %v609_v3, %v608_v1  ;;  %1034 = vmatmul.mubr.msk.f32.vlgmr.msra.gmra.mrb[2].mxu0 %vm308_vm0, %v629_v2  ;;  %v788_v6 = vrot.slane %v1136_v4, %v1594_v35  ;;  %v605_v28 = vmul.f32 %v1136_v4, %v603_v25 }
 0x1fc   : > { %v1138_v7 = vpop.eup %1137 }
 0x1fd   : > { %v1140_v8 = vpop.eup %1139  ;;  %v611_v9 = vrot.slane %v610_v5, 2  ;;  %v615_v10 = vsel %vm308_vm0, %v1138_v7, 0.0  ;;  %v792_v40 = vmul.f32 %v788_v6, %v778_v38 }
 0x1fe   : > { %v616_v11 = vsel %vm308_vm0, %v1140_v8, 0.0  ;;  %v1047_v12 = vpack.c.bf16 %v1140_v8, %v1138_v7 }
 0x1ff   : > { %v612_v13 = vadd.f32 %v611_v9, %v610_v5  ;;  %v617_v14 = vadd.f32 %v616_v11, %v615_v10 }
 0x200   : > { %1048 = vmatpush3.bf16.msra.mxu1 %v1047_v12 }
 0x201   : > { %v613_v17 = vrot.slane %v612_v13, 1  ;;  %v618_v18 = vrot.slane %v617_v14, 4 }
 0x203   : > { %v614_v19 = vadd.f32 %v613_v17, %v612_v13  ;;  %v619_v20 = vadd.f32 %v618_v18, %v617_v14  ;;  %1041 = vmatmul.mubr.msk.f32.vlgmr.msra.gmra.mrb[2].mxu1 %vm308_vm0, %v630_v16 }
 0x205   : > { %v620_v22 = vrot.slane %v619_v20, 2  ;;  %v624_v23 = vadd.f32 %v614_v19, %v604_v21 }
 0x207   : > { %v621_v24 = vadd.f32 %v620_v22, %v619_v20  ;;  %627 = vst.msk [vmem:[#allocation4] sm:$0x1] %vm311_vm2, %v624_v23 }
 0x209   : > { %v622_v26 = vrot.slane %v621_v24, 1 }
 0x20b   : > { %v623_v27 = vadd.f32 %v622_v26, %v621_v24 }
 0x20d   : > { %v625_v29 = vadd.f32 %v623_v27, %v605_v28 }
 0x20e   : > { %v802_v30 = vld [vmem:[#allocation4] sm:$0x1] }
 0x20f   : > { %628 = vst.msk [vmem:[#allocation4 + $0x1] sm:$0x1] %vm311_vm2, %v625_v29  ;;  %1141 = vrcp.f32 %v802_v30 }
 0x216   : > { %v803_v37 = vld [vmem:[#allocation4 + $0x1] sm:$0x1] }
 0x217   : > { %1143 = vrcp.f32 %v803_v37 }
 0x219   : > { %v1142_v39 = vpop.eup %1141 }
 0x21a   : > { %v813_v44 = vrot.slane %v1142_v39, %v1594_v35 }
 0x221   : > { %v1144_v47 = vpop.eup %1143 }
 0x222   : > { %v817_v48 = vrot.slane %v1144_v47, %v1594_v35 }
 0x2ce   : > { %v700_v33 = vpop.f32.mrb[2].mxu0 }
 0x2cf   : > { %v793_v34 = vadd.f32 %v791_v32, %v700_v33  ;;  %v1035_v36 = vpop.f32.mrb[3].mxu0 }
 0x2d1   : > { %795 = vst.msk [vmem:[#allocation5] sm:$0xff] %vm308_vm0, %v793_v34 }
 0x2d6   : > { %v773_v41 = vpop.f32.mrb[2].mxu1 }
 0x2d7   : > { %v794_v42 = vadd.f32 %v792_v40, %v773_v41  ;;  %v1042_v43 = vpop.f32.mrb[3].mxu1 }
 0x2d8   : > { %v806_v45 = vld [vmem:[#allocation5] sm:$0xff] }
 0x2d9   : > { %796 = vst.msk [vmem:[#allocation5 + $0x8] sm:$0xff] %vm308_vm0, %v794_v42  ;;  %v820_v46 = vmul.f32 %v813_v44, %v806_v45 }
 0x2db   : > { %822 = vst.msk [vmem:[%s295_s24] sm:$0xff] %vm308_vm0, %v820_v46 }
 0x2e0   : > { %v807_v49 = vld [vmem:[#allocation5 + $0x8] sm:$0xff] }
 0x2e1   : > { %v821_v50 = vmul.f32 %v817_v48, %v807_v49 }
 0x2e3   : > { %823 = vst.msk [vmem:[%s295_s24 + $0x8] sm:$0xff] %vm308_vm0, %v821_v50 }
 0x2e4   : > { %1248 = shalt.err (!%p1245_p13)
}
 0x2e5   : > { %s1249_s28 = scalar_lea.hbm %s1621_s30, 256  ;;  %s1253_s10 = scalar_lea.hbm %s1676_s3, 512 }
 0x2e6   : > { %p1250_p11 = scmp.ne.s32.totalorder %s1621_s30, %s1249_s28  ;;  %p1254_p7 = scmp.lt.u32.totalorder %s1621_s30, %s1676_s3 }
 0x2e7   : > { %p1255_p4 = scmp.lt.u32.totalorder %s1253_s10, %s1249_s28  ;;  %p1257_p0 = scmp.lt.u32.totalorder %s1249_s28, %s1621_s30 }
 0x2e8   : > { %p1251_p2 = pnand %p1250_p11, %p1705_p10 }
 0x2e9   : > { %p1256_p3 = por %p1255_p4, %p1254_p7 }
 0x2ea   : > { %p1252_p5 = pneg %p1251_p2 }
 0x2eb   : > { %p1258_p8 = por %p1257_p0, %p1256_p3 }
 0x2ed   : > { %p1259_p9 = pnand %p1258_p8, %p1252_p5 }
 0x2ef   : > { %1262 = shalt.err (!%p1259_p9)
}
 0x2f0   : > { %s1333_s11 = smov 128   ;;  %s1334_s19 = smov 8  }
 0x2f1   : > { %1055 = dma.vmem_to_hbm [thread:$0]  (%p1705_p10), %s1623_s20, 256, %s1621_s30, %s825_s6, %s1333_s11, %s1333_s11, %s1334_s19  }
 0x2f2 PF: > { %s854_s9 = sand.u32 1, %s1301_s12   ;;  %p1706_p12 = scmp.ne.s32.totalorder %s1693_s27, 0 }
 0x2f3   : > { %p1707_p1 = scmp.ge.s32.totalorder %s1321_s17, 2  ;;  %s855_s18 = scalar_lea.sflag [#allocation8], %s854_s9 }
 0x2f5   : > { %p1068_p6 = pnand %p1707_p1, %p1706_p12 }
 0x2f7   : > { %1296 = dma.done.wait (!%p1068_p6), %s855_s18, 256  }
 0x2f8   : > { %1298 = vsyncadd (!%p1068_p6), %s855_s18, 4294967040  ;;  %s22_s17 = sadd.s32 1, %s1321_s17   ;;  %s1708_s24 = sld [smem:[#allocation18_spill]] }
 0x2f9   : > { %p19_p13 = scmp.ge.s32.totalorder %s22_s17, 4   ;;  %s1709_s15 = sld [smem:[#allocation16_spill]] }
 0x2fa   : > { %s1710_s16 = sld [smem:[#allocation17_spill]]  ;;  %s1711_s12 = smov %s1305_s13 }
 0x2fb   : > { %s1712_s13 = smov %s1309_s14  ;;  %21 = sbr.rel (!%p19_p13) target bundleno = 10 (0xa), region = 109 }
 0x2fe   : > { %s1713_s14 = smov %s1708_s24 }
 0x302   :  { %860 = vsyncpa [#allocation7], 1 }
 0x303   :  { %862 = vsyncpa [#allocation7 + $0x1], 1 }
 0x304   :  { %863 = vsyncpa [#allocation10], 1 }
 0x305   :  { %865 = vsyncpa [#allocation10 + $0x1], 1 }
 0x306   :  { %866 = vsyncpa [#allocation8], 1 }
 0x307   :  { %868 = vsyncpa [#allocation8 + $0x1], 1 }

</bundles_post_ra>
